<compile_context>
chip_gen: v5e
topology: v5e:2x2
jax: 0.10.0
libtpu: 0.0.40
codegen_flags: <defaults>
</compile_context>

<pallas_src>
import jax
import jax.numpy as jnp
from jax.experimental import pallas as pl
from jax.experimental.pallas import tpu as pltpu


def _round_up(x, m):
    return (x + m - 1) // m * m


# ---------------------------------------------------------------------------
# Kernels
# ---------------------------------------------------------------------------

def _mlp_kernel_resident(feat_ref, w1_ref, b1_ref, w2_ref, b2_ref, out_ref):
    """1-D batch grid; w1/w2/biases fully resident.  No scratch, no pl.when."""
    # feat: (TB, F_pad)  w1: (F_pad, H_pad)  b1: (1, H_pad)
    # w2:   (H_pad, NXp) b2: (1, NXp)        out: (TB, NXp)
    h = jnp.tanh(
        jnp.dot(feat_ref[...], w1_ref[...], preferred_element_type=jnp.float32)
        + b1_ref[...]
    )
    out = jnp.dot(
        h.astype(w2_ref.dtype), w2_ref[...], preferred_element_type=jnp.float32
    ) + b2_ref[...]
    out_ref[...] = out.astype(out_ref.dtype)


def _mlp_kernel_streamed(feat_ref, w1_ref, b1_ref, w2_ref, b2_ref, out_ref, acc_ref):
    """2-D (batch, F-reduction) grid for very large F; f32 accumulator scratch."""
    k = pl.program_id(1)

    @pl.when(k == 0)
    def _():
        acc_ref[...] = jnp.zeros_like(acc_ref)

    acc_ref[...] += jnp.dot(
        feat_ref[...], w1_ref[...], preferred_element_type=jnp.float32
    )

    @pl.when(k == pl.num_programs(1) - 1)
    def _():
        h = jnp.tanh(acc_ref[...] + b1_ref[...])
        out = jnp.dot(
            h.astype(w2_ref.dtype), w2_ref[...], preferred_element_type=jnp.float32
        ) + b2_ref[...]
        out_ref[...] = out.astype(out_ref.dtype)


# ---------------------------------------------------------------------------
# One-time parameter preparation
# ---------------------------------------------------------------------------

def prepare_params(params, *, compute_dtype=jnp.bfloat16, vmem_budget_bytes=4 << 20):
    """Transpose weights from PyTorch (out,in) layout and zero-pad to
    MXU/lane-friendly shapes.  Returns (weights, meta):
      weights: dict of jnp arrays (safe to pass as traced jit args)
      meta:    dict of Python ints/bools (static; reused across calls)

    If the padded w1 fits `vmem_budget_bytes` (kept conservative so the
    double-buffered block stays well inside v5e's 16 MiB scoped VMEM), the
    kernel uses the 1-D resident path; otherwise F is tiled and streamed.
    """
    w1 = jnp.asarray(params["w1"])  # (H, F)
    b1 = jnp.asarray(params["b1"])  # (H,)
    w2 = jnp.asarray(params["w2"])  # (n_x, H)
    b2 = jnp.asarray(params["b2"])  # (n_x,)

    H, F = w1.shape
    n_x = w2.shape[0]

    itemsize = jnp.dtype(compute_dtype).itemsize
    H_pad = _round_up(H, 128)
    NX_pad = _round_up(n_x, 128)                  # lane-dense output store

    w1_resident = _round_up(F, 128) * H_pad * itemsize <= vmem_budget_bytes
    if w1_resident:
        F_pad = _round_up(F, 128)
        TK = F_pad                                # unused on resident path
    else:
        # Streamed fallback: keep double-buffered (TK, H_pad) tiles modest so a
        # large-H f32 config does not breach v5e's 16 MiB default scoped VMEM.
        TK = min(512 if itemsize <= 2 else 256, _round_up(F, 128))
        F_pad = _round_up(F, TK)

    w1t = jnp.zeros((F_pad, H_pad), compute_dtype).at[:F, :H].set(
        w1.T.astype(compute_dtype))
    b1p = jnp.zeros((1, H_pad), jnp.float32).at[0, :H].set(b1.astype(jnp.float32))
    w2t = jnp.zeros((H_pad, NX_pad), compute_dtype).at[:H, :n_x].set(
        w2.T.astype(compute_dtype))
    b2p = jnp.zeros((1, NX_pad), jnp.float32).at[0, :n_x].set(b2.astype(jnp.float32))

    weights = {"w1t": w1t, "b1": b1p, "w2t": w2t, "b2": b2p}
    meta = {"F": F, "H": H, "n_x": n_x, "TK": TK, "w1_resident": bool(w1_resident)}
    return weights, meta


# ---------------------------------------------------------------------------
# Forward
# ---------------------------------------------------------------------------

def feedforward_state_estimator(u, y, weights, meta, *, batch_first=False):
    """u: (seq, B, n_u), y: (seq, B, n_y) if batch_first=False, else batch-first.
    `weights`, `meta` come from prepare_params."""
    # TODO(synk): the concat + transpose glue still materializes one batch-first
    # copy of the activations in XLA; folding it into the kernel needs a
    # multi-contracting-dim dot ('bsc,sch->bh') that Mosaic does not lower
    # efficiently, so it stays here (fused under jit, and now in bf16).
    uy = jnp.concatenate((u, y), axis=-1)
    if not batch_first:
        uy = jnp.swapaxes(uy, 0, 1)
    B = uy.shape[0]
    feat = uy.reshape(B, -1)                      # (B, F)

    F = meta["F"]
    n_x = meta["n_x"]
    assert feat.shape[1] == F, (feat.shape, F)

    w1t, b1p, w2t, b2p = weights["w1t"], weights["b1"], weights["w2t"], weights["b2"]
    compute_dtype = w1t.dtype
    itemsize = jnp.dtype(compute_dtype).itemsize
    F_pad, H_pad = w1t.shape
    NX_pad = w2t.shape[1]

    # Batch tiling: multiple of the sublane packing for the compute dtype
    # (bf16 packs 16 rows per vreg); target 128 so v7x gets >=2 parallel tiles
    # for large batches.
    sub = 16 if itemsize == 2 else (32 if itemsize == 1 else 8)
    TB = min(128, _round_up(B, sub))
    B_pad = _round_up(B, TB)
    nb = B_pad // TB

    # Single fused cast + pad (one materialization of the padded activations).
    feat_p = jnp.pad(feat.astype(compute_dtype),
                     ((0, B_pad - B), (0, F_pad - F)))

    flops = 2 * B_pad * F_pad * H_pad + 2 * B_pad * H_pad * NX_pad
    transcendentals = B_pad * H_pad
    common_bytes = (B_pad * F_pad * itemsize          # feat, streamed once
                    + H_pad * NX_pad * itemsize       # w2, resident
                    + (H_pad + NX_pad) * 4            # biases
                    + B_pad * NX_pad * 4)             # output

    if meta["w1_resident"]:
        cost = pl.CostEstimate(
            flops=flops, transcendentals=transcendentals,
            bytes_accessed=common_bytes + F_pad * H_pad * itemsize)   # w1 once
        out = pl.pallas_call(
            _mlp_kernel_resident,
            out_shape=jax.ShapeDtypeStruct((B_pad, NX_pad), jnp.float32),
            grid_spec=pltpu.PrefetchScalarGridSpec(
                num_scalar_prefetch=0,
                grid=(nb,),
                in_specs=[
                    pl.BlockSpec((TB, F_pad), lambda i: (i, 0)),       # feat tile
                    pl.BlockSpec((F_pad, H_pad), lambda i: (0, 0)),    # w1 resident
                    pl.BlockSpec((1, H_pad), lambda i: (0, 0)),        # b1 resident
                    pl.BlockSpec((H_pad, NX_pad), lambda i: (0, 0)),   # w2 resident
                    pl.BlockSpec((1, NX_pad), lambda i: (0, 0)),       # b2 resident
                ],
                out_specs=pl.BlockSpec((TB, NX_pad), lambda i: (i, 0)),
            ),
            compiler_params=pltpu.CompilerParams(
                dimension_semantics=("parallel",),
            ),
            cost_estimate=cost,
        )(feat_p, w1t, b1p, w2t, b2p)
    else:
        TK = meta["TK"]
        nk = F_pad // TK
        cost = pl.CostEstimate(
            flops=flops, transcendentals=transcendentals,
            # w1 is re-streamed once per batch tile on this path.
            bytes_accessed=common_bytes + nb * F_pad * H_pad * itemsize)
        out = pl.pallas_call(
            _mlp_kernel_streamed,
            out_shape=jax.ShapeDtypeStruct((B_pad, NX_pad), jnp.float32),
            grid_spec=pltpu.PrefetchScalarGridSpec(
                num_scalar_prefetch=0,
                grid=(nb, nk),                        # reduction axis (F) last
                in_specs=[
                    pl.BlockSpec((TB, TK), lambda i, k: (i, k)),        # feat tile
                    pl.BlockSpec((TK, H_pad), lambda i, k: (k, 0)),     # w1 stream
                    pl.BlockSpec((1, H_pad), lambda i, k: (0, 0)),      # b1 resident
                    pl.BlockSpec((H_pad, NX_pad), lambda i, k: (0, 0)), # w2 resident
                    pl.BlockSpec((1, NX_pad), lambda i, k: (0, 0)),     # b2 resident
                ],
                out_specs=pl.BlockSpec((TB, NX_pad), lambda i, k: (i, 0)),
                scratch_shapes=[pltpu.VMEM((TB, H_pad), jnp.float32)],
            ),
            compiler_params=pltpu.CompilerParams(
                dimension_semantics=("parallel", "arbitrary"),
            ),
            cost_estimate=cost,
        )(feat_p, w1t, b1p, w2t, b2p)

    return out[:B, :n_x]


# ---------------------------------------------------------------------------
# Test harness
# ---------------------------------------------------------------------------

def _init_params(key, n_u, n_y, n_x, seq_len, hidden_size):
    # Deterministic synthetic initialization (PyTorch nn.Linear shapes).
    F = (n_u + n_y) * seq_len
    k1, k2, k3, k4 = jax.random.split(key, 4)
    s1 = 1.0 / jnp.sqrt(F)
    s2 = 1.0 / jnp.sqrt(hidden_size)
    return {
        "w1": jax.random.uniform(k1, (hidden_size, F), jnp.float32, -s1, s1),
        "b1": jax.random.uniform(k2, (hidden_size,), jnp.float32, -s1, s1),
        "w2": jax.random.uniform(k3, (n_x, hidden_size), jnp.float32, -s2, s2),
        "b2": jax.random.uniform(k4, (n_x,), jnp.float32, -s2, s2),
    }


def _reference(u, y, params, batch_first=False):
    uy = jnp.concatenate((u, y), axis=-1)
    if not batch_first:
        uy = jnp.swapaxes(uy, 0, 1)
    feat = uy.reshape(uy.shape[0], -1)
    h = jnp.tanh(feat @ params["w1"].T + params["b1"])
    return h @ params["w2"].T + params["b2"]


if __name__ == "__main__":
    # Small shapes consistent with the module.
    n_u, n_y, n_x = 2, 1, 3
    seq_len, batch, hidden = 8, 2, 32

    key = jax.random.PRNGKey(0)
    ku, ky, kp = jax.random.split(key, 3)
    u = jax.random.normal(ku, (seq_len, batch, n_u), jnp.float32)
    y = jax.random.normal(ky, (seq_len, batch, n_y), jnp.float32)
    params = _init_params(kp, n_u, n_y, n_x, seq_len, hidden)
    ref = _reference(u, y, params, batch_first=False)

    # 1) Default path: bf16 weights/activations, w1-resident 1-D batch grid.
    w_bf16, m_bf16 = prepare_params(params)
    fwd_bf16 = jax.jit(
        lambda uu, yy, ww: feedforward_state_estimator(uu, yy, ww, m_bf16))
    out_bf16 = jax.block_until_ready(fwd_bf16(u, y, w_bf16))
    assert out_bf16.shape == (batch, n_x), out_bf16.shape
    assert jnp.allclose(out_bf16, ref, atol=3e-2, rtol=3e-2), "bf16 path mismatch"

    # 2) f32 path: bit-tight check of the resident kernel math.
    w_f32, m_f32 = prepare_params(params, compute_dtype=jnp.float32)
    fwd_f32 = jax.jit(
        lambda uu, yy, ww: feedforward_state_estimator(uu, yy, ww, m_f32))
    out_f32 = jax.block_until_ready(fwd_f32(u, y, w_f32))
    assert jnp.allclose(out_f32, ref, atol=1e-4, rtol=1e-4), "f32 path mismatch"

    # 3) Streamed fallback (force w1 off-VMEM): exercises the 2-D grid kernel.
    w_str, m_str = prepare_params(params, compute_dtype=jnp.float32,
                                  vmem_budget_bytes=0)
    fwd_str = jax.jit(
        lambda uu, yy, ww: feedforward_state_estimator(uu, yy, ww, m_str))
    out_str = jax.block_until_ready(fwd_str(u, y, w_str))
    assert jnp.allclose(out_str, ref, atol=1e-4, rtol=1e-4), "streamed path mismatch"

    print("KERNEL_OK")
</pallas_src>

<mosaic_0001>
module attributes {stable_mosaic.version = 11 : i64} {
  func.func @_mlp_kernel_resident(%arg0: i32, %arg1: memref<16x128xbf16, #tpu.memory_space<vmem>>, %arg2: memref<128x128xbf16, #tpu.memory_space<vmem>>, %arg3: memref<1x128xf32, #tpu.memory_space<vmem>>, %arg4: memref<128x128xbf16, #tpu.memory_space<vmem>>, %arg5: memref<1x128xf32, #tpu.memory_space<vmem>>, %arg6: memref<16x128xf32, #tpu.memory_space<vmem>>) attributes {dimension_semantics = [#tpu.dimension_semantics<parallel>], iteration_bounds = array<i64: 1>, scalar_prefetch = 0 : i64, scratch_operands = 0 : i64, tpu.core_type = #tpu.core_type<tc>, window_params = [{transform_indices = @transform_0, window_bounds = array<i64: 16, 128>}, {pipeline_mode = #tpu.pipeline_mode<synchronous>, transform_indices = @transform_1, window_bounds = array<i64: 128, 128>}, {pipeline_mode = #tpu.pipeline_mode<synchronous>, transform_indices = @transform_2, window_bounds = array<i64: 1, 128>}, {pipeline_mode = #tpu.pipeline_mode<synchronous>, transform_indices = @transform_3, window_bounds = array<i64: 128, 128>}, {pipeline_mode = #tpu.pipeline_mode<synchronous>, transform_indices = @transform_4, window_bounds = array<i64: 1, 128>}, {transform_indices = @transform_5, window_bounds = array<i64: 16, 128>}]} {
    %c0 = arith.constant 0 : index
    %c0_0 = arith.constant 0 : index
    %0 = vector.load %arg1[%c0, %c0_0] : memref<16x128xbf16, #tpu.memory_space<vmem>>, vector<16x128xbf16>
    %c0_1 = arith.constant 0 : index
    %c0_2 = arith.constant 0 : index
    %1 = vector.load %arg2[%c0_1, %c0_2] : memref<128x128xbf16, #tpu.memory_space<vmem>>, vector<128x128xbf16>
    %cst = arith.constant dense<0.000000e+00> : vector<16x128xf32>
    %2 = tpu.matmul %0, %1, %cst {dimension_numbers = #tpu.dot_dimension_numbers<[1], [0], [0], [1], [0, 0, 1, 1], [], []>} : vector<16x128xbf16>, vector<128x128xbf16>, vector<16x128xf32> -> vector<16x128xf32>
    %c0_3 = arith.constant 0 : index
    %c0_4 = arith.constant 0 : index
    %3 = vector.load %arg3[%c0_3, %c0_4] : memref<1x128xf32, #tpu.memory_space<vmem>>, vector<1x128xf32>
    %4 = vector.broadcast %3 : vector<1x128xf32> to vector<16x128xf32>
    %5 = arith.addf %2, %4 : vector<16x128xf32>
    %6 = math.tanh %5 : vector<16x128xf32>
    %7 = arith.truncf %6 : vector<16x128xf32> to vector<16x128xbf16>
    %c0_5 = arith.constant 0 : index
    %c0_6 = arith.constant 0 : index
    %8 = vector.load %arg4[%c0_5, %c0_6] : memref<128x128xbf16, #tpu.memory_space<vmem>>, vector<128x128xbf16>
    %cst_7 = arith.constant dense<0.000000e+00> : vector<16x128xf32>
    %9 = tpu.matmul %7, %8, %cst_7 {dimension_numbers = #tpu.dot_dimension_numbers<[1], [0], [0], [1], [0, 0, 1, 1], [], []>} : vector<16x128xbf16>, vector<128x128xbf16>, vector<16x128xf32> -> vector<16x128xf32>
    %c0_8 = arith.constant 0 : index
    %c0_9 = arith.constant 0 : index
    %10 = vector.load %arg5[%c0_8, %c0_9] : memref<1x128xf32, #tpu.memory_space<vmem>>, vector<1x128xf32>
    %11 = vector.broadcast %10 : vector<1x128xf32> to vector<16x128xf32>
    %12 = arith.addf %9, %11 : vector<16x128xf32>
    %c0_10 = arith.constant 0 : index
    %c0_11 = arith.constant 0 : index
    %13 = vector.load %arg6[%c0_10, %c0_11] : memref<16x128xf32, #tpu.memory_space<vmem>>, vector<16x128xf32>
    tpu.vector_store %arg6[%c0_10, %c0_11], %12 {strides = array<i32>} : memref<16x128xf32, #tpu.memory_space<vmem>>, vector<16x128xf32>,
    return
  }
  func.func @transform_0(%arg0: i32) -> (i32, i32) {
    %c0_i32 = arith.constant 0 : i32
    %c0_i32_0 = arith.constant 0 : i32
    return %arg0, %c0_i32 : i32, i32
  }
  func.func @transform_1(%arg0: i32) -> (i32, i32) {
    %c0_i32 = arith.constant 0 : i32
    %c0_i32_0 = arith.constant 0 : i32
    %c0_i32_1 = arith.constant 0 : i32
    return %c0_i32, %c0_i32_0 : i32, i32
  }
  func.func @transform_2(%arg0: i32) -> (i32, i32) {
    %c0_i32 = arith.constant 0 : i32
    %c0_i32_0 = arith.constant 0 : i32
    %c0_i32_1 = arith.constant 0 : i32
    return %c0_i32, %c0_i32_0 : i32, i32
  }
  func.func @transform_3(%arg0: i32) -> (i32, i32) {
    %c0_i32 = arith.constant 0 : i32
    %c0_i32_0 = arith.constant 0 : i32
    %c0_i32_1 = arith.constant 0 : i32
    return %c0_i32, %c0_i32_0 : i32, i32
  }
  func.func @transform_4(%arg0: i32) -> (i32, i32) {
    %c0_i32 = arith.constant 0 : i32
    %c0_i32_0 = arith.constant 0 : i32
    %c0_i32_1 = arith.constant 0 : i32
    return %c0_i32, %c0_i32_0 : i32, i32
  }
  func.func @transform_5(%arg0: i32) -> (i32, i32) {
    %c0_i32 = arith.constant 0 : i32
    %c0_i32_0 = arith.constant 0 : i32
    return %arg0, %c0_i32 : i32, i32
  }
}

</mosaic_0001>

<bundles_post_ra>
// kernel: _lambda_.1
= control target key start
LH: loop header
LB: loop body
LE: loop exit
PB: predicated region body
PF: predicated region fallthrough
CT: control target
= control target key end

     0   :  { %10 = vsyncpa [#allocation3], 0  ;;  %s437_s0 = inlined_call_operand.vmem [shape: bf16[16,128], index: 0, kind: input, shape index: {}]   ;;  %s438_s1 = inlined_call_operand.hbm [shape: bf16[128,128], index: 1, kind: input, shape index: {}]   ;;  %s439_s2 = inlined_call_operand.vmem [shape: f32[1,128], index: 2, kind: input, shape index: {}]   ;;  %s440_s3 = inlined_call_operand.hbm [shape: bf16[128,128], index: 3, kind: input, shape index: {}]   ;;  %s441_s4 = inlined_call_operand.vmem [shape: f32[1,128], index: 4, kind: input, shape index: {}]   ;;  %s442_s5 = inlined_call_operand.vmem [shape: f32[16,128], index: 5, kind: output, shape index: {}]  }
   0x1   :  { %s18_s20 = sshll.u32 %s438_s1, 4  ;;  %s19_s20 = int_to_ptr.hbm [resolvable:$true] %s18_s20 }
   0x2   :  { %11 = vsyncpa [#allocation5], 0  ;;  %s382_s21 = smov [#allocation2]   ;;  %s33_s25 = sshll.u32 %s440_s3, 4  ;;  %s34_s25 = int_to_ptr.hbm [resolvable:$true] %s33_s25 }
   0x3   :  { %s20_s22 = sshll.u32 %s382_s21, 4  ;;  %s383_s26 = smov 64   ;;  %s21_s22 = int_to_ptr.vmem [resolvable:$true] %s20_s22 }
   0x4   :  { %s384_s27 = smov 4   ;;  %s385_s28 = smov [#allocation4]  }
   0x5   :  { %26 = dma.hbm_to_vmem [thread:$0]  %s19_s20, 1024, %s21_s22, [#allocation3], %s383_s26, %s383_s26, %s384_s27  }
   0x6   :  { %s35_s29 = sshll.u32 %s385_s28, 4  ;;  %s36_s29 = int_to_ptr.vmem [resolvable:$true] %s35_s29 }
   0x7   :  { %41 = dma.hbm_to_vmem [thread:$0]  %s34_s25, 1024, %s36_s29, [#allocation5], %s383_s26, %s383_s26, %s384_s27  }
   0x8   :  { %378 = dma.done.wait [#allocation3], 1024  }
   0x9   :  { %379 = vsyncadd [#allocation3], 4294966272 }
   0xa   :  { %380 = dma.done.wait [#allocation5], 1024  }
   0xb   :  { %381 = vsyncadd [#allocation5], 4294966272  ;;  %v311_v0 = vld [vmem:[#allocation2 + $0x38] sm:$0xff]  ;;  %v310_v1 = vld [vmem:[#allocation2 + $0x30] sm:$0xff] }
   0xc   :  { %128 = vmatpush.bf16.msra.mxu0 %v311_v0  ;;  %v319_v2 = vld [vmem:[#allocation4 + $0x38] sm:$0xff]  ;;  %v318_v3 = vld [vmem:[#allocation4 + $0x30] sm:$0xff]  ;;  %v309_v4 = vld [vmem:[#allocation2 + $0x28] sm:$0xff] }
   0xd   :  { %213 = vmatpush.bf16.msra.mxu1 %v319_v2  ;;  %v317_v5 = vld [vmem:[#allocation4 + $0x28] sm:$0xff]  ;;  %v308_v6 = vld [vmem:[#allocation2 + $0x20] sm:$0xff]  ;;  %v307_v7 = vld [vmem:[#allocation2 + $0x18] sm:$0xff] }
   0xe   :  { %v306_v8 = vld [vmem:[#allocation2 + $0x10] sm:$0xff]  ;;  %v305_v9 = vld [vmem:[#allocation2 + $0x8] sm:$0xff]  ;;  %v304_v10 = vld [vmem:[#allocation2] sm:$0xff] }
   0xf   :  { %v303_v11 = vld [vmem:[%s437_s0] sm:$0xff]  ;;  %v315_v13 = vld [vmem:[#allocation4 + $0x18] sm:$0xff]  ;;  %v314_v14 = vld [vmem:[#allocation4 + $0x10] sm:$0xff] }
  0x10   :  { %129 = vmatpush.bf16.msra.mxu0 %v310_v1  ;;  %v316_v12 = vld [vmem:[#allocation4 + $0x20] sm:$0xff]  ;;  %v313_v15 = vld [vmem:[#allocation4 + $0x8] sm:$0xff] }
  0x11   :  { %214 = vmatpush.bf16.msra.mxu1 %v318_v3  ;;  %v312_v16 = vld [vmem:[#allocation4] sm:$0xff] }
  0x12   :  { %v324_v18 = vld [vmem:[%s439_s2] ss:$0 sm:$0xff] }
  0x13   :  { %v325_v25 = vld [vmem:[%s441_s4] ss:$0 sm:$0xff] }
  0x14   :  { %130 = vmatpush.bf16.msra.mxu0 %v309_v4 }
  0x15   :  { %215 = vmatpush.bf16.msra.mxu1 %v317_v5 }
  0x18   :  { %131 = vmatpush.bf16.msra.mxu0 %v308_v6 }
  0x19   :  { %216 = vmatpush.bf16.msra.mxu1 %v316_v12 }
  0x1c   :  { %132 = vmatpush.bf16.msra.mxu0 %v307_v7 }
  0x1d   :  { %217 = vmatpush.bf16.msra.mxu1 %v315_v13 }
  0x20   :  { %133 = vmatpush.bf16.msra.mxu0 %v306_v8 }
  0x21   :  { %218 = vmatpush.bf16.msra.mxu1 %v314_v14 }
  0x24   :  { %134 = vmatpush.bf16.msra.mxu0 %v305_v9 }
  0x25   :  { %219 = vmatpush.bf16.msra.mxu1 %v313_v15 }
  0x28   :  { %135 = vmatpush.bf16.msra.mxu0 %v304_v10 }
  0x29   :  { %220 = vmatpush.bf16.msra.mxu1 %v312_v16 }
  0x2b   :  { %136 = vmatmul.bf16.vlgmr.msra.gmra.mxu0 %v303_v11 }
  0xa8   :  { %v137_v17 = vpop.f32.mrf.mxu0 }
  0xa9   :  { %v138_v19 = vadd.f32 %v324_v18, %v137_v17 }
  0xab   :  { %326 = vtanh.f32 %v138_v19 }
  0xb0   :  { %v139_v20 = vpop.f32.mrf.mxu0 }
  0xb1   :  { %v140_v21 = vadd.f32 %v324_v18, %v139_v20  ;;  %v327_v22 = vpop.eup %326 }
  0xb3   :  { %328 = vtanh.f32 %v140_v21 }
  0xb9   :  { %v329_v23 = vpop.eup %328 }
  0xba   :  { %v144_v24 = vpack.c.bf16 %v329_v23, %v327_v22 }
  0xbc   :  { %221 = vmatmul.bf16.vlgmr.msra.gmra.mxu1 %v144_v24 }
 0x139   :  { %v222_v26 = vpop.f32.mrf.mxu1 }
 0x13a   :  { %v223_v27 = vadd.f32 %v325_v25, %v222_v26 }
 0x13c   :  { %227 = vst [vmem:[%s442_s5] sm:$0xff] %v223_v27 }
 0x141   :  { %v224_v28 = vpop.f32.mrf.mxu1 }
 0x142   :  { %v225_v29 = vadd.f32 %v325_v25, %v224_v28 }
 0x144   :  { %228 = vst [vmem:[%s442_s5 + $0x8] sm:$0xff] %v225_v29 }
 0x145   :  { %233 = vsyncpa [#allocation3], 1 }
 0x146   :  { %234 = vsyncpa [#allocation5], 1 }

</bundles_post_ra>
